<compile_context>
chip_gen: v5e
topology: v5e:2x2
jax: 0.10.0
libtpu: 0.0.40
codegen_flags: <defaults>
</compile_context>

<pallas_src>
import functools
import math

import jax
import jax.numpy as jnp
from jax.experimental import pallas as pl
from jax.experimental.pallas import tpu as pltpu


# --------------------------------------------------------------------------
# Device / sizing helpers
# --------------------------------------------------------------------------
def _vmem_capacity_bytes():
    """Physical per-core VMEM capacity; conservative 64 MiB if unqueryable."""
    try:
        info = pltpu.get_tpu_info()
        for name in ("vmem_capacity_bytes", "vmem_size_bytes", "vmem_bytes"):
            val = getattr(info, name, None)
            if val:
                return int(val)
    except Exception:
        pass
    return 64 << 20


def _chunk_bounds(total, chunk):
    bounds, a = [], 0
    while a < total:
        b = min(a + chunk, total)
        bounds.append((a, b))
        a = b
    return bounds


# --------------------------------------------------------------------------
# In-kernel helpers
# --------------------------------------------------------------------------
def _conv1d_row(row, w_ref):
    """Conv1d(1, 1, k, padding=k//2, bias=False) over channels on a (1, C) row.

    k static lane-rolls + scaled adds (XLU + VPU slots); zero padding emulated
    by masking the wrapped-around lanes.
    """
    C = row.shape[1]
    k = w_ref.shape[0]
    pad = k // 2
    lane = jax.lax.broadcasted_iota(jnp.int32, (1, C), 1)
    out = jnp.zeros((1, C), jnp.float32)
    for j in range(k):                        # k is tiny (3..7): fully unrolled
        d = j - pad                           # out[c] += w[j] * row[c + d]
        shifted = row if d == 0 else pltpu.roll(row, shift=(-d) % C, axis=1)
        valid = (lane + d >= 0) & (lane + d < C)
        out = out + w_ref[j] * jnp.where(valid, shifted, 0.0)
    return out


def _gate_from_pooled(pooled_col, fcwT_ref, fcb_ref, w_ref, mf_ref):
    """pooled (C, 1) f32 -> per-channel sigmoid gate (C, 1) f32 (FCA gate math)."""
    pooled = jnp.transpose(pooled_col)                       # (1, C) lane-dense
    x1 = _conv1d_row(pooled, w_ref)                          # conv1 over channels
    x2 = jnp.dot(pooled, fcwT_ref[...],
                 preferred_element_type=jnp.float32) + fcb_ref[...]   # fc (1x1 conv)
    s1 = jnp.sum(x1, axis=-1, keepdims=True)                 # (1, 1)
    s2 = jnp.sum(x2, axis=-1, keepdims=True)                 # (1, 1)
    out1 = jax.nn.sigmoid(s1 * x2)                           # sum(x1 @ x2, dim=1)
    out2 = jax.nn.sigmoid(s2 * x1)                           # sum(x2^T @ x1^T, dim=1)
    mf = mf_ref[0]                                           # sigmoid(mix.w), SMEM scalar
    mixed = out1 * mf + out2 * (1.0 - mf)                    # Mix
    gate = jax.nn.sigmoid(_conv1d_row(mixed, w_ref))         # conv1 + sigmoid
    return jnp.transpose(gate)                               # (C, 1) for broadcast


# --------------------------------------------------------------------------
# Kernels
# --------------------------------------------------------------------------
def _fca_single_kernel(w_ref, mf_ref, x_ref, fcwT_ref, fcb_ref, o_ref, *, chunk):
    # x_ref: (1, C, HW) for one batch element, fully resident in VMEM.
    C, HW = x_ref.shape[1], x_ref.shape[2]
    bounds = _chunk_bounds(HW, chunk)
    # Pooled mean over HW accumulated in f32 lane-chunks, so only a (C, chunk)
    # f32 temporary is ever live (no full-block f32 copy for bf16 inputs).
    acc = jnp.zeros((C, 1), jnp.float32)
    for a, b in bounds:
        acc = acc + jnp.sum(x_ref[0, :, a:b].astype(jnp.float32),
                            axis=-1, keepdims=True)
    pooled_col = acc * (1.0 / HW)                             # AdaptiveAvgPool2d(1)
    gate_col = _gate_from_pooled(pooled_col, fcwT_ref, fcb_ref, w_ref, mf_ref)
    # Gate multiply in f32, chunk by chunk; cast to the output dtype on store.
    for a, b in bounds:
        o_ref[0, :, a:b] = (x_ref[0, :, a:b].astype(jnp.float32)
                            * gate_col).astype(o_ref.dtype)


def _fca_pool_kernel(x_ref, psum_ref, acc_ref, *, true_hw):
    # Fallback Pass A: pooled-sum reduction over HW tiles. Ragged last tile is
    # masked in-kernel (no wrapper-side jnp.pad of x).
    t = pl.program_id(1)

    @pl.when(t == 0)
    def _init():
        acc_ref[...] = jnp.zeros_like(acc_ref)

    C, thw = x_ref.shape[1], x_ref.shape[2]
    lane = jax.lax.broadcasted_iota(jnp.int32, (C, thw), 1)
    valid = (t * thw + lane) < true_hw
    xs = jnp.where(valid, x_ref[0].astype(jnp.float32), 0.0)
    acc_ref[...] += jnp.sum(xs, axis=-1, keepdims=True)

    @pl.when(t == pl.num_programs(1) - 1)
    def _finalize():
        psum_ref[0] = acc_ref[...]


def _fca_apply_gate_kernel(x_ref, gate_ref, o_ref):
    # Fallback Pass B: lane-dense broadcast multiply per HW tile (f32 math,
    # cast on store). OOB lanes of the ragged last tile are dropped on store.
    o_ref[0] = (x_ref[0].astype(jnp.float32) * gate_ref[0]).astype(o_ref.dtype)


# --------------------------------------------------------------------------
# Plain-JAX gate math used between the two fallback passes (O(B*C^2), tiny)
# --------------------------------------------------------------------------
def _conv1d_channels_jax(v, w):
    # Conv1d(1, 1, k, padding=k//2, bias=False) over the channel axis. v: (B, C).
    k = w.shape[0]
    pad = k // 2
    C = v.shape[1]
    vp = jnp.pad(v, ((0, 0), (pad, pad)))
    out = jnp.zeros_like(v)
    for j in range(k):
        out = out + w[j] * vp[:, j:j + C]
    return out


def _gate_from_pooled_jax(pooled, conv_w, fc_wT, fc_b, mix_factor):
    # pooled: (B, C) f32 -> per-channel gate (B, C) f32.
    x1 = _conv1d_channels_jax(pooled, conv_w)
    x2 = pooled @ fc_wT + fc_b
    out1 = jax.nn.sigmoid(jnp.sum(x1, axis=-1, keepdims=True) * x2)
    out2 = jax.nn.sigmoid(jnp.sum(x2, axis=-1, keepdims=True) * x1)
    mixed = out1 * mix_factor + out2 * (1.0 - mix_factor)
    return jax.nn.sigmoid(_conv1d_channels_jax(mixed, conv_w))


# --------------------------------------------------------------------------
# Wrapper
# --------------------------------------------------------------------------
def fc_attention(x_nchw, conv1_w, fc_w, fc_b, mix_w, *,
                 force_tiled=False, hw_tile=None,
                 single_pass_vmem_budget=None, donate_input=False):
    """FCAttention forward. x: (B, C, H, W); conv1_w: (k,); fc_w: (C, C); fc_b: (C,)."""
    B, C, H, W = x_nchw.shape
    HW = H * W
    dtype = x_nchw.dtype
    itemsize = jnp.dtype(dtype).itemsize

    x = x_nchw.reshape(B, C, HW)
    fcwT = jnp.asarray(fc_w, jnp.float32).T                    # (C_in, C_out)
    fcb_row = jnp.asarray(fc_b, jnp.float32).reshape(1, C)     # lane-dense bias row
    conv_w = jnp.asarray(conv1_w, jnp.float32).reshape(-1)     # (k,)  -> SMEM
    mf = jax.nn.sigmoid(jnp.asarray(mix_w, jnp.float32)).reshape(1)  # -> SMEM

    # ---- Per-generation VMEM budgeting (v5e/v6e ~128 MiB, v7x ~64 MiB). ----
    cap = _vmem_capacity_bytes()
    limit_cap = max(32 << 20, (cap * 7) // 8)      # never request > physical VMEM
    if single_pass_vmem_budget is None:
        single_pass_vmem_budget = (cap * 3) // 4   # ~48 MiB v7x, ~96 MiB v5e/v6e
    budget = min(int(single_pass_vmem_budget), limit_cap)

    block_bytes = C * HW * itemsize
    weight_bytes = 2 * 4 * (C * C + C)             # fcwT + fcb, f32, double-buffered
    n_chunks_max = 16
    chunk = max(1024, -(-HW // n_chunks_max))
    chunk = -(-chunk // 128) * 128
    chunk_tmp_bytes = 2 * C * min(chunk, HW) * 4   # f32 lane-chunk temporaries
    # in + out blocks (double-buffered each) + weights + chunk temps + headroom
    single_need = 4 * block_bytes + weight_bytes + chunk_tmp_bytes + (2 << 20)

    bytes_moved = 2 * B * C * HW * itemsize + 4 * C * (C + 1)

    if (not force_tiled) and single_need <= budget:
        # Traffic-optimal path: 1 read + 1 write of x, gate math on-chip.
        out = pl.pallas_call(
            functools.partial(_fca_single_kernel, chunk=chunk),
            out_shape=jax.ShapeDtypeStruct((B, C, HW), dtype),
            grid_spec=pltpu.PrefetchScalarGridSpec(
                num_scalar_prefetch=0,
                grid=(B,),
                in_specs=[
                    pl.BlockSpec(memory_space=pltpu.SMEM),          # conv1d taps (k,)
                    pl.BlockSpec(memory_space=pltpu.SMEM),          # sigmoid(mix_w)
                    pl.BlockSpec((1, C, HW), lambda b: (b, 0, 0)),  # x
                    pl.BlockSpec((C, C), lambda b: (0, 0)),         # fc_w^T (const idx)
                    pl.BlockSpec((1, C), lambda b: (0, 0)),         # fc_b row (const idx)
                ],
                out_specs=pl.BlockSpec((1, C, HW), lambda b: (b, 0, 0)),
            ),
            compiler_params=pltpu.CompilerParams(
                dimension_semantics=("parallel",),
                vmem_limit_bytes=int(min(max(single_need, 32 << 20), limit_cap))),
            cost_estimate=pl.CostEstimate(
                flops=int(3 * B * C * HW + 4 * B * C * C),
                transcendentals=int(4 * B * C),
                bytes_accessed=int(bytes_moved)),
            input_output_aliases={2: 0} if donate_input else {},
        )(conv_w, mf, x, fcwT, fcb_row)
        return out.reshape(B, C, H, W)

    # -------- Tiled two-pass fallback: whole (C, HW) block too big for VMEM. ----
    # No wrapper-side padding/slicing of x: ragged last HW tile handled in-kernel.
    if hw_tile is not None:
        thw = int(hw_tile)
    else:
        # MiB-range tiles: ~6 MiB blocks on 128 MiB parts, ~3 MiB on v7x.
        target_tile = (6 << 20) if cap >= (96 << 20) else (3 << 20)
        per_lane = C * (4 * itemsize + 4)          # in+out dbl-buffered + f32 tmp
        thw = min(target_tile // (C * itemsize),
                  max(128, ((cap * 3) // 5) // per_lane))
    hw_ceil = -(-HW // 128) * 128
    thw = max(128, (min(int(thw), hw_ceil) // 128) * 128)     # lane-dense tiles
    n_t = -(-HW // thw)

    pass_a_need = 2 * C * thw * itemsize + 2 * C * thw * 4 + C * 4 + (2 << 20)
    pass_b_need = 4 * C * thw * itemsize + C * thw * 4 + C * 4 + (2 << 20)
    tiled_limit = int(min(max(max(pass_a_need, pass_b_need), 32 << 20), limit_cap))

    # Pass A: pooled sums per (batch, channel); HW-tile reduction axis last.
    psum = pl.pallas_call(
        functools.partial(_fca_pool_kernel, true_hw=HW),
        out_shape=jax.ShapeDtypeStruct((B, C, 1), jnp.float32),
        grid_spec=pltpu.PrefetchScalarGridSpec(
            num_scalar_prefetch=0,
            grid=(B, n_t),
            in_specs=[pl.BlockSpec((1, C, thw), lambda b, t: (b, 0, t))],
            out_specs=pl.BlockSpec((1, C, 1), lambda b, t: (b, 0, 0)),
            scratch_shapes=[pltpu.VMEM((C, 1), jnp.float32)],
        ),
        compiler_params=pltpu.CompilerParams(
            dimension_semantics=("parallel", "arbitrary"),
            vmem_limit_bytes=tiled_limit),
        cost_estimate=pl.CostEstimate(
            flops=int(2 * B * C * HW),
            transcendentals=0,
            bytes_accessed=int(B * C * HW * itemsize + 4 * B * C)),
    )(x)

    # Tiny gate math between the passes in plain JAX: keeps the (C, C) fc weight
    # out of the VMEM-starved tiled pipeline.
    pooled = psum[:, :, 0] * (1.0 / HW)
    gate = _gate_from_pooled_jax(pooled, conv_w, fcwT, fcb_row[0], mf[0])
    gate3 = gate[:, :, None]                                  # (B, C, 1) f32

    # Pass B: broadcast gate multiply, tiled over HW (both grid axes parallel,
    # so v7x's two TensorCores split the work even at B == 1).
    y = pl.pallas_call(
        _fca_apply_gate_kernel,
        out_shape=jax.ShapeDtypeStruct((B, C, HW), dtype),
        grid_spec=pltpu.PrefetchScalarGridSpec(
            num_scalar_prefetch=0,
            grid=(B, n_t),
            in_specs=[
                pl.BlockSpec((1, C, thw), lambda b, t: (b, 0, t)),
                pl.BlockSpec((1, C, 1), lambda b, t: (b, 0, 0)),
            ],
            out_specs=pl.BlockSpec((1, C, thw), lambda b, t: (b, 0, t)),
        ),
        compiler_params=pltpu.CompilerParams(
            dimension_semantics=("parallel", "parallel"),
            vmem_limit_bytes=tiled_limit),
        cost_estimate=pl.CostEstimate(
            flops=int(B * C * HW),
            transcendentals=0,
            bytes_accessed=int(2 * B * C * HW * itemsize + 4 * B * C)),
    )(x, gate3)
    return y.reshape(B, C, H, W)


# --------------------------------------------------------------------------
# Pure-JAX reference (mirrors the PyTorch forward) for correctness checking
# --------------------------------------------------------------------------
def fca_reference(x, conv1_w, fc_w, fc_b, mix_w):
    B, C, H, W = x.shape
    pooled = jnp.mean(x, axis=(2, 3))                          # (B, C)
    k = conv1_w.shape[0]
    pad = k // 2

    def conv1d(v):                                             # v: (B, C)
        vp = jnp.pad(v, ((0, 0), (pad, pad)))
        return jnp.stack(
            [jnp.sum(vp[:, c:c + k] * conv1_w, axis=-1) for c in range(C)], axis=-1)

    x1 = conv1d(pooled)
    x2 = pooled @ fc_w.T + fc_b
    out1 = jax.nn.sigmoid(jnp.sum(x1, axis=-1, keepdims=True) * x2)
    out2 = jax.nn.sigmoid(jnp.sum(x2, axis=-1, keepdims=True) * x1)
    mf = jax.nn.sigmoid(mix_w)
    mixed = out1 * mf + out2 * (1.0 - mf)
    gate = jax.nn.sigmoid(conv1d(mixed))
    return x * gate[:, :, None, None]


if __name__ == "__main__":
    def run_case(B, C, H, W, key):
        b_param, gamma = 1, 2
        t = int(abs((math.log(C, 2) + b_param) / gamma))
        k = t if t % 2 else t + 1                              # C=16 -> k=3

        k0, k1, k2, k3 = jax.random.split(key, 4)
        x = jax.random.normal(k0, (B, C, H, W), dtype=jnp.float32)
        conv1_w = jax.random.normal(k1, (k,), dtype=jnp.float32) * 0.5
        fc_w = jax.random.normal(k2, (C, C), dtype=jnp.float32) / math.sqrt(C)
        fc_b = jax.random.normal(k3, (C,), dtype=jnp.float32) * 0.1
        mix_w = jnp.float32(-0.8)                              # Mix parameter init

        ref = fca_reference(x, conv1_w, fc_w, fc_b, mix_w)

        # Primary single-pass path.
        out = jax.block_until_ready(fc_attention(x, conv1_w, fc_w, fc_b, mix_w))
        assert out.shape == (B, C, H, W)
        err = float(jnp.max(jnp.abs(out - ref)))
        assert jnp.allclose(out, ref, atol=2e-5, rtol=2e-5), ("single", err)

        # Tiled two-pass fallback (forced, 128-lane tiles -> multi-tile reduction
        # and, when HW % 128 != 0, a ragged masked last tile).
        out_t = jax.block_until_ready(
            fc_attention(x, conv1_w, fc_w, fc_b, mix_w,
                         force_tiled=True, hw_tile=128))
        err_t = float(jnp.max(jnp.abs(out_t - ref)))
        assert jnp.allclose(out_t, ref, atol=2e-5, rtol=2e-5), ("tiled", err_t)

    key = jax.random.PRNGKey(0)
    key_a, key_b = jax.random.split(key)
    run_case(2, 16, 16, 16, key_a)   # HW = 256: two even 128-lane fallback tiles
    run_case(2, 16, 12, 12, key_b)   # HW = 144: ragged last tile (mask + OOB drop)
    print("KERNEL_OK")
</pallas_src>

<mosaic_0001>
module attributes {stable_mosaic.version = 11 : i64} {
  func.func @_fca_single_kernel(%arg0: i32, %arg1: memref<3xf32, #tpu.memory_space<smem>>, %arg2: memref<1xf32, #tpu.memory_space<smem>>, %arg3: memref<1x16x256xf32, #tpu.memory_space<vmem>>, %arg4: memref<16x16xf32, #tpu.memory_space<vmem>>, %arg5: memref<1x16xf32, #tpu.memory_space<vmem>>, %arg6: memref<1x16x256xf32, #tpu.memory_space<vmem>>) attributes {dimension_semantics = [#tpu.dimension_semantics<parallel>], iteration_bounds = array<i64: 2>, scalar_prefetch = 0 : i64, scratch_operands = 0 : i64, tpu.core_type = #tpu.core_type<tc>, window_params = [{transform_indices = @transform_0, window_bounds = array<i64: 3>}, {transform_indices = @transform_1, window_bounds = array<i64: 1>}, {transform_indices = @transform_2, window_bounds = array<i64: 1, 16, 256>}, {pipeline_mode = #tpu.pipeline_mode<synchronous>, transform_indices = @transform_3, window_bounds = array<i64: 16, 16>}, {pipeline_mode = #tpu.pipeline_mode<synchronous>, transform_indices = @transform_4, window_bounds = array<i64: 1, 16>}, {transform_indices = @transform_5, window_bounds = array<i64: 1, 16, 256>}]} {
    %cst = arith.constant 0.000000e+00 : f32
    %0 = vector.broadcast %cst : f32 to vector<16x1xf32>
    %c0 = arith.constant 0 : index
    %c0_0 = arith.constant 0 : index
    %c0_1 = arith.constant 0 : index
    %1 = vector.load %arg3[%c0, %c0_0, %c0_1] : memref<1x16x256xf32, #tpu.memory_space<vmem>>, vector<1x16x256xf32>
    %2 = vector.shape_cast %1 : vector<1x16x256xf32> to vector<16x256xf32>
    %cst_2 = arith.constant dense<0.000000e+00> : vector<16xf32>
    %3 = vector.multi_reduction <add>, %2, %cst_2 [1] : vector<16x256xf32> to vector<16xf32>
    %4 = vector.shape_cast %3 : vector<16xf32> to vector<16x1xf32>
    %5 = arith.addf %0, %4 : vector<16x1xf32>
    %cst_3 = arith.constant 3.906250e-03 : f32
    %6 = vector.broadcast %cst_3 : f32 to vector<16x1xf32>
    %7 = arith.mulf %5, %6 : vector<16x1xf32>
    %8 = tpu.transpose %7, [1, 0] : vector<16x1xf32> -> vector<1x16xf32>
    %9 = tpu.iota {dimensions = array<i32: 1>} : vector<1x16xi32>
    %cst_4 = arith.constant 0.000000e+00 : f32
    %10 = vector.broadcast %cst_4 : f32 to vector<1x16xf32>
    %c1_i32 = arith.constant 1 : i32
    %11 = tpu.dynamic_rotate %8 by %c1_i32 dim 1 : vector<1x16xf32>, i32 -> vector<1x16xf32>
    %c-1_i32 = arith.constant -1 : i32
    %12 = vector.broadcast %c-1_i32 : i32 to vector<1x16xi32>
    %13 = arith.addi %9, %12 : vector<1x16xi32>
    %c0_i32 = arith.constant 0 : i32
    %14 = vector.broadcast %c0_i32 : i32 to vector<1x16xi32>
    %15 = arith.cmpi sge, %13, %14 : vector<1x16xi32>
    %c-1_i32_5 = arith.constant -1 : i32
    %16 = vector.broadcast %c-1_i32_5 : i32 to vector<1x16xi32>
    %17 = arith.addi %9, %16 : vector<1x16xi32>
    %c16_i32 = arith.constant 16 : i32
    %18 = vector.broadcast %c16_i32 : i32 to vector<1x16xi32>
    %19 = arith.cmpi slt, %17, %18 : vector<1x16xi32>
    %20 = arith.andi %15, %19 : vector<1x16xi1>
    %c0_6 = arith.constant 0 : index
    %21 = memref.load %arg1[%c0_6] : memref<3xf32, #tpu.memory_space<smem>>
    %cst_7 = arith.constant 0.000000e+00 : f32
    %22 = vector.broadcast %cst_7 : f32 to vector<1x16xf32>
    %23 = arith.select %20, %11, %22 : vector<1x16xi1>, vector<1x16xf32>
    %24 = vector.broadcast %21 : f32 to vector<1x16xf32>
    %25 = arith.mulf %24, %23 : vector<1x16xf32>
    %26 = arith.addf %10, %25 : vector<1x16xf32>
    %c0_i32_8 = arith.constant 0 : i32
    %27 = vector.broadcast %c0_i32_8 : i32 to vector<1x16xi32>
    %28 = arith.addi %9, %27 : vector<1x16xi32>
    %c0_i32_9 = arith.constant 0 : i32
    %29 = vector.broadcast %c0_i32_9 : i32 to vector<1x16xi32>
    %30 = arith.cmpi sge, %28, %29 : vector<1x16xi32>
    %c0_i32_10 = arith.constant 0 : i32
    %31 = vector.broadcast %c0_i32_10 : i32 to vector<1x16xi32>
    %32 = arith.addi %9, %31 : vector<1x16xi32>
    %c16_i32_11 = arith.constant 16 : i32
    %33 = vector.broadcast %c16_i32_11 : i32 to vector<1x16xi32>
    %34 = arith.cmpi slt, %32, %33 : vector<1x16xi32>
    %35 = arith.andi %30, %34 : vector<1x16xi1>
    %c1 = arith.constant 1 : index
    %36 = memref.load %arg1[%c1] : memref<3xf32, #tpu.memory_space<smem>>
    %cst_12 = arith.constant 0.000000e+00 : f32
    %37 = vector.broadcast %cst_12 : f32 to vector<1x16xf32>
    %38 = arith.select %35, %8, %37 : vector<1x16xi1>, vector<1x16xf32>
    %39 = vector.broadcast %36 : f32 to vector<1x16xf32>
    %40 = arith.mulf %39, %38 : vector<1x16xf32>
    %41 = arith.addf %26, %40 : vector<1x16xf32>
    %c15_i32 = arith.constant 15 : i32
    %42 = tpu.dynamic_rotate %8 by %c15_i32 dim 1 : vector<1x16xf32>, i32 -> vector<1x16xf32>
    %c1_i32_13 = arith.constant 1 : i32
    %43 = vector.broadcast %c1_i32_13 : i32 to vector<1x16xi32>
    %44 = arith.addi %9, %43 : vector<1x16xi32>
    %c0_i32_14 = arith.constant 0 : i32
    %45 = vector.broadcast %c0_i32_14 : i32 to vector<1x16xi32>
    %46 = arith.cmpi sge, %44, %45 : vector<1x16xi32>
    %c1_i32_15 = arith.constant 1 : i32
    %47 = vector.broadcast %c1_i32_15 : i32 to vector<1x16xi32>
    %48 = arith.addi %9, %47 : vector<1x16xi32>
    %c16_i32_16 = arith.constant 16 : i32
    %49 = vector.broadcast %c16_i32_16 : i32 to vector<1x16xi32>
    %50 = arith.cmpi slt, %48, %49 : vector<1x16xi32>
    %51 = arith.andi %46, %50 : vector<1x16xi1>
    %c2 = arith.constant 2 : index
    %52 = memref.load %arg1[%c2] : memref<3xf32, #tpu.memory_space<smem>>
    %cst_17 = arith.constant 0.000000e+00 : f32
    %53 = vector.broadcast %cst_17 : f32 to vector<1x16xf32>
    %54 = arith.select %51, %42, %53 : vector<1x16xi1>, vector<1x16xf32>
    %55 = vector.broadcast %52 : f32 to vector<1x16xf32>
    %56 = arith.mulf %55, %54 : vector<1x16xf32>
    %57 = arith.addf %41, %56 : vector<1x16xf32>
    %c0_18 = arith.constant 0 : index
    %c0_19 = arith.constant 0 : index
    %58 = vector.load %arg4[%c0_18, %c0_19] : memref<16x16xf32, #tpu.memory_space<vmem>>, vector<16x16xf32>
    %cst_20 = arith.constant dense<0.000000e+00> : vector<1x16xf32>
    %59 = tpu.matmul %8, %58, %cst_20 {dimension_numbers = #tpu.dot_dimension_numbers<[1], [0], [0], [1], [0, 0, 1, 1], [], []>} : vector<1x16xf32>, vector<16x16xf32>, vector<1x16xf32> -> vector<1x16xf32>
    %c0_21 = arith.constant 0 : index
    %c0_22 = arith.constant 0 : index
    %60 = vector.load %arg5[%c0_21, %c0_22] : memref<1x16xf32, #tpu.memory_space<vmem>>, vector<1x16xf32>
    %61 = arith.addf %59, %60 : vector<1x16xf32>
    %cst_23 = arith.constant dense<0.000000e+00> : vector<1xf32>
    %62 = vector.multi_reduction <add>, %57, %cst_23 [1] : vector<1x16xf32> to vector<1xf32>
    %63 = vector.shape_cast %62 : vector<1xf32> to vector<1x1xf32>
    %cst_24 = arith.constant dense<0.000000e+00> : vector<1xf32>
    %64 = vector.multi_reduction <add>, %61, %cst_24 [1] : vector<1x16xf32> to vector<1xf32>
    %65 = vector.shape_cast %64 : vector<1xf32> to vector<1x1xf32>
    %66 = vector.broadcast %63 : vector<1x1xf32> to vector<1x16xf32>
    %67 = arith.mulf %66, %61 : vector<1x16xf32>
    %68 = arith.negf %67 : vector<1x16xf32>
    %69 = math.exp %68 : vector<1x16xf32>
    %cst_25 = arith.constant 1.000000e+00 : f32
    %70 = vector.broadcast %cst_25 : f32 to vector<1x16xf32>
    %71 = arith.addf %70, %69 : vector<1x16xf32>
    %72 = arith.divf %70, %71 : vector<1x16xf32>
    %73 = vector.broadcast %65 : vector<1x1xf32> to vector<1x16xf32>
    %74 = arith.mulf %73, %57 : vector<1x16xf32>
    %75 = arith.negf %74 : vector<1x16xf32>
    %76 = math.exp %75 : vector<1x16xf32>
    %cst_26 = arith.constant 1.000000e+00 : f32
    %77 = vector.broadcast %cst_26 : f32 to vector<1x16xf32>
    %78 = arith.addf %77, %76 : vector<1x16xf32>
    %79 = arith.divf %77, %78 : vector<1x16xf32>
    %c0_27 = arith.constant 0 : index
    %80 = memref.load %arg2[%c0_27] : memref<1xf32, #tpu.memory_space<smem>>
    %81 = vector.broadcast %80 : f32 to vector<1x16xf32>
    %82 = arith.mulf %72, %81 : vector<1x16xf32>
    %cst_28 = arith.constant 1.000000e+00 : f32
    %83 = arith.subf %cst_28, %80 : f32
    %84 = vector.broadcast %83 : f32 to vector<1x16xf32>
    %85 = arith.mulf %79, %84 : vector<1x16xf32>
    %86 = arith.addf %82, %85 : vector<1x16xf32>
    %87 = tpu.iota {dimensions = array<i32: 1>} : vector<1x16xi32>
    %cst_29 = arith.constant 0.000000e+00 : f32
    %88 = vector.broadcast %cst_29 : f32 to vector<1x16xf32>
    %c1_i32_30 = arith.constant 1 : i32
    %89 = tpu.dynamic_rotate %86 by %c1_i32_30 dim 1 : vector<1x16xf32>, i32 -> vector<1x16xf32>
    %c-1_i32_31 = arith.constant -1 : i32
    %90 = vector.broadcast %c-1_i32_31 : i32 to vector<1x16xi32>
    %91 = arith.addi %87, %90 : vector<1x16xi32>
    %c0_i32_32 = arith.constant 0 : i32
    %92 = vector.broadcast %c0_i32_32 : i32 to vector<1x16xi32>
    %93 = arith.cmpi sge, %91, %92 : vector<1x16xi32>
    %c-1_i32_33 = arith.constant -1 : i32
    %94 = vector.broadcast %c-1_i32_33 : i32 to vector<1x16xi32>
    %95 = arith.addi %87, %94 : vector<1x16xi32>
    %c16_i32_34 = arith.constant 16 : i32
    %96 = vector.broadcast %c16_i32_34 : i32 to vector<1x16xi32>
    %97 = arith.cmpi slt, %95, %96 : vector<1x16xi32>
    %98 = arith.andi %93, %97 : vector<1x16xi1>
    %c0_35 = arith.constant 0 : index
    %99 = memref.load %arg1[%c0_35] : memref<3xf32, #tpu.memory_space<smem>>
    %cst_36 = arith.constant 0.000000e+00 : f32
    %100 = vector.broadcast %cst_36 : f32 to vector<1x16xf32>
    %101 = arith.select %98, %89, %100 : vector<1x16xi1>, vector<1x16xf32>
    %102 = vector.broadcast %99 : f32 to vector<1x16xf32>
    %103 = arith.mulf %102, %101 : vector<1x16xf32>
    %104 = arith.addf %88, %103 : vector<1x16xf32>
    %c0_i32_37 = arith.constant 0 : i32
    %105 = vector.broadcast %c0_i32_37 : i32 to vector<1x16xi32>
    %106 = arith.addi %87, %105 : vector<1x16xi32>
    %c0_i32_38 = arith.constant 0 : i32
    %107 = vector.broadcast %c0_i32_38 : i32 to vector<1x16xi32>
    %108 = arith.cmpi sge, %106, %107 : vector<1x16xi32>
    %c0_i32_39 = arith.constant 0 : i32
    %109 = vector.broadcast %c0_i32_39 : i32 to vector<1x16xi32>
    %110 = arith.addi %87, %109 : vector<1x16xi32>
    %c16_i32_40 = arith.constant 16 : i32
    %111 = vector.broadcast %c16_i32_40 : i32 to vector<1x16xi32>
    %112 = arith.cmpi slt, %110, %111 : vector<1x16xi32>
    %113 = arith.andi %108, %112 : vector<1x16xi1>
    %c1_41 = arith.constant 1 : index
    %114 = memref.load %arg1[%c1_41] : memref<3xf32, #tpu.memory_space<smem>>
    %cst_42 = arith.constant 0.000000e+00 : f32
    %115 = vector.broadcast %cst_42 : f32 to vector<1x16xf32>
    %116 = arith.select %113, %86, %115 : vector<1x16xi1>, vector<1x16xf32>
    %117 = vector.broadcast %114 : f32 to vector<1x16xf32>
    %118 = arith.mulf %117, %116 : vector<1x16xf32>
    %119 = arith.addf %104, %118 : vector<1x16xf32>
    %c15_i32_43 = arith.constant 15 : i32
    %120 = tpu.dynamic_rotate %86 by %c15_i32_43 dim 1 : vector<1x16xf32>, i32 -> vector<1x16xf32>
    %c1_i32_44 = arith.constant 1 : i32
    %121 = vector.broadcast %c1_i32_44 : i32 to vector<1x16xi32>
    %122 = arith.addi %87, %121 : vector<1x16xi32>
    %c0_i32_45 = arith.constant 0 : i32
    %123 = vector.broadcast %c0_i32_45 : i32 to vector<1x16xi32>
    %124 = arith.cmpi sge, %122, %123 : vector<1x16xi32>
    %c1_i32_46 = arith.constant 1 : i32
    %125 = vector.broadcast %c1_i32_46 : i32 to vector<1x16xi32>
    %126 = arith.addi %87, %125 : vector<1x16xi32>
    %c16_i32_47 = arith.constant 16 : i32
    %127 = vector.broadcast %c16_i32_47 : i32 to vector<1x16xi32>
    %128 = arith.cmpi slt, %126, %127 : vector<1x16xi32>
    %129 = arith.andi %124, %128 : vector<1x16xi1>
    %c2_48 = arith.constant 2 : index
    %130 = memref.load %arg1[%c2_48] : memref<3xf32, #tpu.memory_space<smem>>
    %cst_49 = arith.constant 0.000000e+00 : f32
    %131 = vector.broadcast %cst_49 : f32 to vector<1x16xf32>
    %132 = arith.select %129, %120, %131 : vector<1x16xi1>, vector<1x16xf32>
    %133 = vector.broadcast %130 : f32 to vector<1x16xf32>
    %134 = arith.mulf %133, %132 : vector<1x16xf32>
    %135 = arith.addf %119, %134 : vector<1x16xf32>
    %136 = arith.negf %135 : vector<1x16xf32>
    %137 = math.exp %136 : vector<1x16xf32>
    %cst_50 = arith.constant 1.000000e+00 : f32
    %138 = vector.broadcast %cst_50 : f32 to vector<1x16xf32>
    %139 = arith.addf %138, %137 : vector<1x16xf32>
    %140 = arith.divf %138, %139 : vector<1x16xf32>
    %141 = tpu.transpose %140, [1, 0] : vector<1x16xf32> -> vector<16x1xf32>
    %c0_51 = arith.constant 0 : index
    %c0_52 = arith.constant 0 : index
    %c0_53 = arith.constant 0 : index
    %142 = vector.load %arg3[%c0_51, %c0_52, %c0_53] : memref<1x16x256xf32, #tpu.memory_space<vmem>>, vector<1x16x256xf32>
    %143 = vector.shape_cast %142 : vector<1x16x256xf32> to vector<16x256xf32>
    %144 = vector.broadcast %141 : vector<16x1xf32> to vector<16x256xf32>
    %145 = arith.mulf %143, %144 : vector<16x256xf32>
    %c0_54 = arith.constant 0 : index
    %c0_55 = arith.constant 0 : index
    %c0_56 = arith.constant 0 : index
    %146 = vector.load %arg6[%c0_54, %c0_55, %c0_56] : memref<1x16x256xf32, #tpu.memory_space<vmem>>, vector<1x16x256xf32>
    %147 = vector.shape_cast %146 : vector<1x16x256xf32> to vector<16x256xf32>
    %148 = vector.shape_cast %145 : vector<16x256xf32> to vector<1x16x256xf32>
    tpu.vector_store %arg6[%c0_54, %c0_55, %c0_56], %148 {strides = array<i32>} : memref<1x16x256xf32, #tpu.memory_space<vmem>>, vector<1x16x256xf32>,
    return
  }
  func.func @transform_0(%arg0: i32) -> i32 {
    %c0_i32 = arith.constant 0 : i32
    %c0_i32_0 = arith.constant 0 : i32
    return %c0_i32 : i32
  }
  func.func @transform_1(%arg0: i32) -> i32 {
    %c0_i32 = arith.constant 0 : i32
    %c0_i32_0 = arith.constant 0 : i32
    return %c0_i32 : i32
  }
  func.func @transform_2(%arg0: i32) -> (i32, i32, i32) {
    %c0_i32 = arith.constant 0 : i32
    %c0_i32_0 = arith.constant 0 : i32
    %c0_i32_1 = arith.constant 0 : i32
    return %arg0, %c0_i32, %c0_i32_0 : i32, i32, i32
  }
  func.func @transform_3(%arg0: i32) -> (i32, i32) {
    %c0_i32 = arith.constant 0 : i32
    %c0_i32_0 = arith.constant 0 : i32
    %c0_i32_1 = arith.constant 0 : i32
    return %c0_i32, %c0_i32_0 : i32, i32
  }
  func.func @transform_4(%arg0: i32) -> (i32, i32) {
    %c0_i32 = arith.constant 0 : i32
    %c0_i32_0 = arith.constant 0 : i32
    %c0_i32_1 = arith.constant 0 : i32
    return %c0_i32, %c0_i32_0 : i32, i32
  }
  func.func @transform_5(%arg0: i32) -> (i32, i32, i32) {
    %c0_i32 = arith.constant 0 : i32
    %c0_i32_0 = arith.constant 0 : i32
    %c0_i32_1 = arith.constant 0 : i32
    return %arg0, %c0_i32, %c0_i32_0 : i32, i32, i32
  }
}

</mosaic_0001>

<bundles_post_ra>
// kernel: tpu_custom_call.1
= control target key start
LH: loop header
LB: loop body
LE: loop exit
PB: predicated region body
PF: predicated region fallthrough
CT: control target
= control target key end

     0   :  { %s1192_s0 = inlined_call_operand.vmem [shape: f32[3], index: 0, kind: input, shape index: {}]   ;;  %s1193_s1 = inlined_call_operand.<no memory space> [shape: f32[1], index: 1, kind: input, shape index: {}]   ;;  %s1194_s2 = inlined_call_operand.hbm [shape: f32[2,16,256], index: 2, kind: input, shape index: {}]   ;;  %s1195_s3 = inlined_call_operand.hbm [shape: f32[16,16], index: 3, kind: input, shape index: {}]   ;;  %s1196_s4 = inlined_call_operand.vmem [shape: f32[1,16], index: 4, kind: input, shape index: {}]   ;;  %s1197_s5 = inlined_call_operand.hbm [shape: f32[2,16,256], index: 5, kind: output, shape index: {}]  }
   0x1   :  { %1198 = sst [smem:[#allocation15_spill]] %s1192_s0 }
   0x2   :  { %1199 = sst [smem:[#allocation16_spill]] %s1195_s3 }
   0x3   :  { %10 = sst [smem:[#allocation2]] %s1193_s1 }
   0x4   :  { %11 = vsyncpa [#allocation6], 0 }
   0x5   :  { %12 = vsyncpa [#allocation4], 0 }
   0x6   :  { %14 = vsyncpa [#allocation4 + $0x1], 0 }
   0x7   :  { %15 = vsyncpa [#allocation9], 0 }
   0x8   :  { %16 = vsyncpa [#allocation5], 0 }
   0x9   :  { %18 = vsyncpa [#allocation5 + $0x1], 0  ;;  %s960_s20 = smov 0   ;;  %s962_s21 = smov 0  }
   0xa   :  { %s964_s22 = smov 0   ;;  %s966_s23 = smov 0  }
   0xb LB: > { %s981_s1 = sadd.s32 4294967295, %s914_s23   ;;  %s648_s24 = sadd.s32 4294967294, %s914_s23   ;;  %s914_s23 = sphi %s966_s23, %s1214_s23   ;;  %s910_s22 = sphi %s964_s22, %s1213_s22   ;;  %s906_s21 = sphi %s962_s21, %s1212_s21   ;;  %s902_s20 = sphi %s960_s20, %s1211_s20  }
   0xc   : > { %s985_s25 = sadd.s32 1, %s914_s23   ;;  %s73_s26 = sadd.s32 1, %s910_s22 }
   0xd   : > { %s70_s27 = ssub.s32 %s914_s23, %s985_s25  ;;  %p80_p0 = scmp.ne.s32.totalorder %s910_s22, %s906_s21 }
   0xe   : > { %p71_p1 = scmp.eq.s32.totalorder %s70_s27, 0  ;;  %p81_p2 = scmp.eq.s32.totalorder %s914_s23, 0 }
   0xf   : > { %p86_p3 = scmp.ne.s32.totalorder %s906_s21, %s902_s20  ;;  %p87_p4 = scmp.eq.s32.totalorder %s981_s1, 0 }
  0x10   : > { %s997_s28 = scalar_select %p71_p1, %s910_s22, %s73_s26  }
  0x11   : > { %p999_p5 = por %p81_p2, %p80_p0  ;;  %p1005_p6 = por %p87_p4, %p86_p3 }
  0x12   : > { %p152_p7 = scmp.eq.s32.totalorder %s981_s1, 1  ;;  %p158_p8 = scmp.eq.s32.totalorder %s648_s24, 1 }
  0x13   : > { %p649_p9 = scmp.ge.s32.totalorder %s914_s23, 1  ;;  %p165_p10 = scmp.lt.s32.totalorder %s914_s23, 3 }
  0x14   : > { %p1012_p11 = por %p152_p7, %p80_p0  ;;  %p1016_p12 = por %p158_p8, %p86_p3 }
  0x15   : > { %p1020_p13 = pnand %p649_p9, %p165_p10  ;;  %s1205_s0 = sld [smem:[#allocation15_spill]] }
  0x16   : > { %p703_p2 = scmp.lt.s32.totalorder %s914_s23, 2  ;;  %s1206_s3 = sld [smem:[#allocation16_spill]] }
  0x17   : > { %p686_p1 = pneg %p1020_p13  ;;  %s916_s16 = smov [#allocation3]  }
  0x18   : > { %p1038_p7 = pnand %p703_p2, %p999_p5  ;;  %s917_s17 = smov [#allocation8]  }
  0x19   : > { %p687_p3 = pnand %p686_p1, %p87_p4  ;;  %s191_s18 = sshll.u32 %s917_s17, 4  ;;  %s192_s18 = int_to_ptr.vmem [resolvable:$true] %s191_s18 }
  0x1a   : > { %s208_s19 = sand.u32 1, %s910_s22   ;;  %s918_s24 = smov 128  }
  0x1b   : > { %s177_s11 = sshll.u32 %s1205_s0, 4  ;;  %s919_s26 = smov 8   ;;  %s178_s11 = int_to_ptr.vmem [resolvable:$true] %s177_s11 }
  0x1c   : > { %s189_s14 = sshll.u32 %s1206_s3, 4  ;;  %s653_s27 = sshll.u32 %s208_s19, 5  ;;  %s190_s14 = int_to_ptr.hbm [resolvable:$true] %s189_s14 }
  0x1d   : > { %689 = dma.vmem_to_smem (!%p687_p3), %s178_s11, 16, %s916_s16, [#allocation6]  }
  0x1e   : > { %692 = dma.hbm_to_vmem [thread:$0]  (!%p687_p3), %s190_s14, 256, %s192_s18, [#allocation9], %s918_s24, %s918_s24, %s919_s26  }
  0x1f   : > { %s672_s9 = sshll.u32 %s914_s23, 5  ;;  %s212_s13 = scalar_lea.vmem [#allocation7], %s653_s27 }
  0x20   : > { %s217_s29 = scalar_lea.hbm %s1194_s2, %s672_s9  ;;  %s220_s0 = sshll.u32 %s212_s13, 4  ;;  %s221_s0 = int_to_ptr.vmem [resolvable:$true] %s220_s0 }
  0x21   : > { %s218_s3 = sshll.u32 %s217_s29, 4  ;;  %s209_s11 = scalar_lea.sflag [#allocation4], %s208_s19  ;;  %s219_s3 = int_to_ptr.hbm [resolvable:$true] %s218_s3 }
  0x22   : > { %s810_s16 = sshra.s32 %s219_s3, 4  ;;  %p814_p8 = pneg %p1038_p7  ;;  %s811_s16 = int_to_ptr.hbm [resolvable:$true] %s810_s16 }
  0x23   : > { %s812_s17 = scalar_lea.hbm %s811_s16, 32  ;;  %s817_s24 = scalar_lea.hbm %s1194_s2, 64 }
  0x24   : > { %p813_p5 = scmp.ne.s32.totalorder %s811_s16, %s812_s17  ;;  %p818_p1 = scmp.lt.s32.totalorder %s811_s16, %s1194_s2 }
  0x25   : > { %p819_p2 = scmp.lt.s32.totalorder %s817_s24, %s812_s17 }
  0x26   : > { %p815_p9 = pnand %p814_p8, %p813_p5 }
  0x27   : > { %p820_p3 = por %p819_p2, %p818_p1 }
  0x28   : > { %p816_p10 = pneg %p815_p9 }
  0x2a   : > { %p821_p0 = pnand %p820_p3, %p816_p10 }
  0x2c   : > { %824 = shalt.err (!%p821_p0)
}
  0x2d   : > { %s920_s19 = smov 256   ;;  %s921_s27 = smov 16  }
  0x2e   : > { %696 = dma.hbm_to_vmem [thread:$0]  (!%p1038_p7), %s219_s3, 512, %s221_s0, %s209_s11, %s920_s19, %s920_s19, %s921_s27  }
  0x2f   : > { %232 = sbr.rel (%p1020_p13) target bundleno = 1428 (0x594), region = 40 }
  0x34   : > { %885 = dma.done.wait (%p87_p4), [#allocation6], 16  }
  0x35   : > { %887 = vsyncadd (%p87_p4), [#allocation6], 4294967280  ;;  %s1064_s10 = sand.u32 1, %s906_s21  }
  0x36   : > { %s658_s12 = sshll.u32 %s1064_s10, 5  ;;  %s240_s29 = scalar_lea.sflag [#allocation4], %s1064_s10 }
  0x37   : > { %s243_s0 = scalar_lea.vmem [#allocation7], %s658_s12 }
  0x38   : > { %889 = dma.done.wait (%p1005_p6), %s240_s29, 512  }
  0x39   : > { %891 = vsyncadd (%p1005_p6), %s240_s29, 4294966784 }
  0x3a   : > { %893 = dma.done.wait (%p87_p4), [#allocation9], 256  }
  0x3b   : > { %895 = vsyncadd (%p87_p4), [#allocation9], 4294967040 }
  0x3c   : > { %254 = sfence }
  0x3d   : > { %v1078_v0 = vld [vmem:[%s243_s0] sm:$0xff]  ;;  %v1080_v1 = vld [vmem:[%s243_s0 + $0x8] sm:$0xff]  ;;  %v1084_v3 = vld [vmem:[%s243_s0 + $0x10] sm:$0xff]  ;;  %vm368_vm0 = vcmask 130048   ;;  %s922_s3 = smov 16   ;;  %vm325_vm1 = vcmask 1047680   ;;  %v323_v21 = vlaneseq }
  0x3e   : > { %v281_v2 = vadd.f32 %v1080_v1, %v1078_v0  ;;  %v1086_v4 = vld [vmem:[%s243_s0 + $0x18] sm:$0xff]  ;;  %v366_v6 = vld [vmem:[#allocation8 + $0x8] sm:$0xff]  ;;  %v365_v7 = vld [vmem:[#allocation8] sm:$0xff]  ;;  %s923_s30 = smov 127   ;;  %s924_s8 = smov 113   ;;  %vm392_vm2 = vcmask 122880  }
  0x3f   : > { %v284_v5 = vadd.f32 %v1086_v4, %v1084_v3  ;;  %386 = vmatpush.msra.mxu0 %v366_v6  ;;  %v367_v17 = vld [vmem:[%s1196_s4] sm:$0x1]  ;;  %v1100_v22 = vand.u32 127, %v323_v21  ;;  %s1102_s11 = sld [smem:[#allocation3 + $0x1]]  ;;  %s673_s24 = sshll.u32 %s981_s1, 5 }
  0x40   : > { %282 = vadd.xlane.f32.xlu0 %v281_v2  ;;  %s1105_s16 = sld [smem:[#allocation3]]  ;;  %s276_s26 = scalar_lea.vmem [#allocation10], %s658_s12 }
  0x41   : > { %387 = vmatpush.msra.mxu0 %v365_v7  ;;  %v332_v23 = vadd.s32 4294967295, %v1100_v22  ;;  %s1107_s17 = sld [smem:[#allocation3 + $0x2]]  ;;  %v1110_v24 = vadd.s32 1, %v1100_v22  ;;  %vm346_vm5 = vcmp.lt.s32.totalorder %v1100_v22, 16  ;;  %s549_s27 = scalar_lea.hbm %s1197_s5, %s673_s24 }
  0x42   : > { %s439_s14 = sld [smem:[#allocation2]]  ;;  %s550_s29 = sshll.u32 %s276_s26, 4  ;;  %s551_s29 = int_to_ptr.vmem [resolvable:$true] %s550_s29 }
  0x43   : > { %vm333_vm3 = vcmp.ge.s32.totalorder %v332_v23, 0  ;;  %vm334_vm4 = vcmp.lt.s32.totalorder %v332_v23, 16  ;;  %vm355_vm6 = vcmp.lt.s32.totalorder %v1110_v24, 16  ;;  %s552_s0 = sshll.u32 %s549_s27, 4  ;;  %s538_s1 = scalar_lea.sflag [#allocation5], %s1064_s10  ;;  %s553_s0 = int_to_ptr.hbm [resolvable:$true] %s552_s0 }
  0x44   : > { %vm1114_vm7 = vmand %vm333_vm3, %vm334_vm4  ;;  %s854_s12 = sshra.s32 %s553_s0, 4  ;;  %s860_s13 = scalar_lea.hbm %s1197_s5, 64  ;;  %s855_s12 = int_to_ptr.hbm [resolvable:$true] %s854_s12 }
  0x45   : > { %v350_v28 = vstv %s1102_s11  ;;  %p861_p0 = scmp.lt.s32.totalorder %s855_s12, %s1197_s5 }
  0x46   : > { %v342_v26 = vstv %s1105_s16 }
  0x47   : > { %v362_v31 = vstv %s1107_s17 }
  0x48   : > { %285 = vadd.xlane.f32.xlu0 %v284_v5  ;;  %s442_s18 = ssub.f32 1.0, %s439_s14 }
  0xb3   : > { %v283_v8 = vpop.xlane.xlu0 %282 }
  0xb4   : > { %v289_v9 = vmul.f32 0.00390625, %v283_v8  ;;  %v440_v8 = vstv %s439_s14 }
  0xb6   : > { %291 = vxpose.xlu1.b32.start [1/2] (short) (narrow) %v289_v9, 8  ;;  %v443_v9 = vstv %s442_s18 }
  0xbb   : > { %v286_v10 = vpop.xlane.xlu0 %285 }
  0xbc   : > { %v290_v11 = vmul.f32 0.00390625, %v286_v10 }
  0xbe   : > { %292 = vxpose.xlu1.b32.end [2/2] (short) (narrow) %v290_v11, 8 }
 0x15a   : > { %v307_v12 = vpop.trf.xlu1 }
 0x15b   : > { %663 = vmatmul.msk.f32.vlgmr.msra.gmra.mxu0 %vm368_vm0, %v307_v12  ;;  %326 = vrot.lane.b32.xlu2 %v307_v12, %s922_s3  ;;  %v349_v27 = vsel %vm346_vm5, %v307_v12, 0.0 }
 0x15c   : > { %v351_v34 = vmul.f32 %v350_v28, %v349_v27 }
 0x1b5   : > { %v327_v13 = vpop.permute.xlu2 %326 }
 0x1b6   : > { %v328_v14 = vsel %vm325_vm1, %v327_v13, %v307_v12 }
 0x1b7   : > { %329 = vrot.lane.b32.xlu2 %v328_v14, %s922_s3 }
 0x1d8   : > { %v389_v18 = vpop.f32.mrf.mxu0 }
 0x1d9   : > { %v390_v19 = vadd.f32 %v389_v18, %v367_v17 }
 0x1db   : > { %v396_v20 = vsel %vm392_vm2, %v390_v19, 0.0 }
 0x211   : > { %v330_v15 = vpop.permute.xlu2 %329 }
 0x212   : > { %v331_v16 = vsel %vm325_vm1, %v330_v15, %v307_v12 }
 0x213   : > { %358 = vrot.lane.b32.xlu1 %v331_v16, %s923_s30  ;;  %338 = vrot.lane.b32.xlu0 %v331_v16, %s924_s8 }
 0x23d   : > { %397 = vadd.xlane.f32.xlu0 %v396_v20 }
 0x285   : > { %v359_v29 = vpop.permute.xlu1 %358  ;;  %v339_v30 = vpop.permute.xlu0 %338 }
 0x286   : > { %v361_v32 = vsel %vm355_vm6, %v359_v29, 0.0  ;;  %v341_v33 = vsel %vm1114_vm7, %v339_v30, 0.0 }
 0x287   : > { %v343_v35 = vmul.f32 %v342_v26, %v341_v33  ;;  %v363_v36 = vmul.f32 %v362_v31, %v361_v32 }
 0x289   : > { %v352_v37 = vadd.f32 %v351_v34, %v343_v35  ;;  %v925_v34 = vmov 0  }
 0x28a   : > { %751 = vset.pattern.permute.xlu0 %v925_v34  ;;  %752 = vset.pattern.permute.xlu1 %v925_v34 }
 0x28b   : > { %v364_v38 = vadd.f32 %v363_v36, %v352_v37 }
 0x28d   : > { %v393_v39 = vsel %vm392_vm2, %v364_v38, 0.0 }
 0x28e   : > { %394 = vadd.xlane.f32.xlu2 %v393_v39 }
 0x2b0   : > { %v398_v40 = vpop.xlane.xlu0 %397 }
 0x2b1   : > { %v419_v41 = vmul.f32 %v398_v40, %v364_v38 }
 0x2b3   : > { %v665_v42 = vmul.f32 -1.442695, %v419_v41 }
 0x2b5   : > { %753 = vpow2.f32 %v665_v42 }
 0x2bb   : > { %v754_v43 = vpop.eup %753 }
 0x2bc   : > { %v423_v44 = vadd.f32 1.0, %v754_v43 }
 0x2be   : > { %755 = vrcp.f32 %v423_v44  ;;  %v435_v57 = vand.u32 2147483648, %v423_v44  ;;  %vm429_vm9 = vweird.f32 %v423_v44  ;;  %v433_v59 = vand.u32 2147483647, %v423_v44 }
 0x2c0   : > { %v436_v2 = vor.u32 1.1754944e-38, %v435_v57  ;;  %vm434_vm13 = vcmp.eq.f32.partialorder %v433_v59, 8.507059e+37 }
 0x2c4   : > { %v756_v48 = vpop.eup %755 }
 0x2c5   : > { %v425_v49 = vmul.f32 %v756_v48, %v423_v44  ;;  %vm430_vm8 = vweird.f32 %v756_v48 }
 0x2c6   : > { %vm431_vm10 = vmor %vm429_vm9, %vm430_vm8 }
 0x2c7   : > { %v426_v52 = vsub.f32 1.0, %v425_v49 }
 0x2c9   : > { %v427_v53 = vmul.f32 %v756_v48, %v426_v52 }
 0x2cb   : > { %v428_v56 = vadd.f32 %v756_v48, %v427_v53 }
 0x2cd   : > { %v432_v63 = vsel %vm431_vm10, %v756_v48, %v428_v56 }
 0x2ce   : > { %v437_v7 = vsel %vm434_vm13, %v436_v2, %v432_v63 }
 0x2cf   : > { %v444_v13 = vmul.f32 %v443_v9, %v437_v7 }
 0x301   : > { %v395_v45 = vpop.xlane.xlu2 %394 }
 0x302   : > { %v399_v46 = vmul.f32 %v395_v45, %v390_v19 }
 0x304   : > { %v664_v47 = vmul.f32 -1.442695, %v399_v46 }
 0x306   : > { %757 = vpow2.f32 %v664_v47 }
 0x30c   : > { %v758_v50 = vpop.eup %757 }
 0x30d   : > { %v403_v51 = vadd.f32 1.0, %v758_v50 }
 0x30f   : > { %759 = vrcp.f32 %v403_v51  ;;  %v415_v60 = vand.u32 2147483648, %v403_v51  ;;  %v413_v62 = vand.u32 2147483647, %v403_v51  ;;  %vm409_vm12 = vweird.f32 %v403_v51 }
 0x311   : > { %v416_v6 = vor.u32 1.1754944e-38, %v415_v60  ;;  %vm414_vm15 = vcmp.eq.f32.partialorder %v413_v62, 8.507059e+37 }
 0x315   : > { %v760_v54 = vpop.eup %759 }
 0x316   : > { %v405_v55 = vmul.f32 %v760_v54, %v403_v51  ;;  %vm410_vm11 = vweird.f32 %v760_v54 }
 0x317   : > { %vm411_vm14 = vmor %vm409_vm12, %vm410_vm11 }
 0x318   : > { %v406_v58 = vsub.f32 1.0, %v405_v55 }
 0x31a   : > { %v407_v61 = vmul.f32 %v760_v54, %v406_v58 }
 0x31c   : > { %v408_v5 = vadd.f32 %v760_v54, %v407_v61 }
 0x31e   : > { %v412_v10 = vsel %vm411_vm14, %v760_v54, %v408_v5 }
 0x31f   : > { %v417_v11 = vsel %vm414_vm15, %v416_v6, %v412_v10 }
 0x320   : > { %v441_v12 = vmul.f32 %v440_v8, %v417_v11 }
 0x322   : > { %v445_v14 = vadd.f32 %v444_v13, %v441_v12 }
 0x324   : > { %446 = vrot.lane.b32.xlu2 %v445_v14, %s922_s3  ;;  %v459_v21 = vsel %vm346_vm5, %v445_v14, 0.0 }
 0x325   : > { %v460_v27 = vmul.f32 %v459_v21, %v350_v28 }
 0x37e   : > { %v447_v15 = vpop.permute.xlu2 %446 }
 0x37f   : > { %v448_v16 = vsel %vm325_vm1, %v447_v15, %v445_v14 }
 0x380   : > { %449 = vrot.lane.b32.xlu0 %v448_v16, %s922_s3 }
 0x3f2   : > { %v450_v17 = vpop.permute.xlu0 %449 }
 0x3f3   : > { %v451_v18 = vsel %vm325_vm1, %v450_v17, %v445_v14 }
 0x3f4   : > { %453 = vrot.lane.b32.xlu2 %v451_v18, %s924_s8 }
 0x3fc   : > { %462 = vrot.lane.b32.xlu2 %v451_v18, %s923_s30  ;;  %s856_s30 = scalar_lea.hbm %s855_s12, 32 }
 0x3fd   : > { %p857_p4 = scmp.ne.s32.totalorder %s855_s12, %s856_s30  ;;  %p862_p7 = scmp.lt.s32.totalorder %s860_s13, %s856_s30 }
 0x3ff   : > { %p858_p6 = pnand %p857_p4, %p1012_p11  ;;  %p863_p5 = por %p862_p7, %p861_p0 }
 0x401   : > { %p859_p13 = pneg %p858_p6 }
 0x403   : > { %p864_p8 = pnand %p863_p5, %p859_p13 }
 0x44e   : > { %v454_v19 = vpop.permute.xlu2 %453 }
 0x44f   : > { %v456_v20 = vsel %vm1114_vm7, %v454_v19, 0.0 }
 0x450   : > { %v457_v23 = vmul.f32 %v456_v20, %v342_v26 }
 0x452   : > { %v461_v32 = vadd.f32 %v460_v27, %v457_v23 }
 0x456   : > { %v463_v29 = vpop.permute.xlu2 %462 }
 0x457   : > { %v465_v30 = vsel %vm355_vm6, %v463_v29, 0.0 }
 0x458   : > { %v466_v33 = vmul.f32 %v465_v30, %v362_v31 }
 0x45a   : > { %v467_v35 = vadd.f32 %v466_v33, %v461_v32 }
 0x45c   : > { %v666_v25 = vmul.f32 -1.442695, %v467_v35 }
 0x45e   : > { %761 = vpow2.f32 %v666_v25 }
 0x464   : > { %v762_v36 = vpop.eup %761 }
 0x465   : > { %v471_v22 = vadd.f32 1.0, %v762_v36 }
 0x467   : > { %763 = vrcp.f32 %v471_v22  ;;  %v483_v28 = vand.u32 2147483648, %v471_v22  ;;  %v481_v24 = vand.u32 2147483647, %v471_v22  ;;  %vm477_vm1 = vweird.f32 %v471_v22 }
 0x469   : > { %v484_v31 = vor.u32 1.1754944e-38, %v483_v28  ;;  %vm482_vm3 = vcmp.eq.f32.partialorder %v481_v24, 8.507059e+37 }
 0x46d   : > { %v764_v37 = vpop.eup %763 }
 0x46e   : > { %v473_v26 = vmul.f32 %v764_v37, %v471_v22  ;;  %vm478_vm0 = vweird.f32 %v764_v37 }
 0x46f   : > { %vm479_vm2 = vmor %vm477_vm1, %vm478_vm0 }
 0x470   : > { %v474_v38 = vsub.f32 1.0, %v473_v26 }
 0x472   : > { %v475_v39 = vmul.f32 %v764_v37, %v474_v38 }
 0x474   : > { %v476_v40 = vadd.f32 %v764_v37, %v475_v39 }
 0x476   : > { %v480_v41 = vsel %vm479_vm2, %v764_v37, %v476_v40 }
 0x477   : > { %v485_v42 = vsel %vm482_vm3, %v484_v31, %v480_v41 }
 0x478   : > { %487 = vxpose.xlu2.b32.start.end [1/1] (short) (narrow) %v485_v42, 16 }
 0x511   : > { %v503_v43 = vpop.trf.xlu2 }
 0x512   : > { %521 = vperm.xlu0 %751, %v503_v43  }
 0x519   : > { %v504_v44 = vpop.trf.xlu2 }
 0x51a   : > { %526 = vperm.xlu1 %752, %v504_v44  }
 0x584   : > { %v522_v45 = vpop.permute.xlu0 %521 }
 0x585   : > { %v529_v46 = vmul.f32 %v522_v45, %v1078_v0  ;;  %v530_v47 = vmul.f32 %v522_v45, %v1080_v1 }
 0x587   : > { %533 = vst [vmem:[%s276_s26] sm:$0xff] %v529_v46 }
 0x588   : > { %534 = vst [vmem:[%s276_s26 + $0x8] sm:$0xff] %v530_v47 }
 0x58c   : > { %v527_v48 = vpop.permute.xlu1 %526 }
 0x58d   : > { %v531_v49 = vmul.f32 %v527_v48, %v1084_v3  ;;  %v532_v0 = vmul.f32 %v527_v48, %v1086_v4 }
 0x58f   : > { %535 = vst [vmem:[%s276_s26 + $0x10] sm:$0xff] %v531_v49 }
 0x590   : > { %536 = vst [vmem:[%s276_s26 + $0x18] sm:$0xff] %v532_v0 }
 0x591   : > { %867 = shalt.err (!%p864_p8)
}
 0x592   : > { %s926_s10 = smov 256  }
 0x593   : > { %684 = dma.vmem_to_hbm [thread:$0]  (%p1012_p11), %s551_s29, 512, %s553_s0, %s538_s1, %s926_s10, %s926_s10, %s922_s3  }
 0x594 PF: > { %s567_s17 = sand.u32 1, %s902_s20   ;;  %p1210_p9 = scmp.ge.s32.totalorder %s914_s23, 2 }
 0x595   : > { %s568_s14 = scalar_lea.sflag [#allocation5], %s567_s17 }
 0x596   : > { %p698_p10 = pnand %p1210_p9, %p1016_p12 }
 0x598   : > { %p699_p1 = pneg %p698_p10 }
 0x59a   : > { %897 = dma.done.wait (%p699_p1), %s568_s14, 512  }
 0x59b   : > { %899 = vsyncadd (%p699_p1), %s568_s14, 4294966784  ;;  %p21_p2 = scmp.ge.s32.totalorder %s985_s25, 4   ;;  %s1211_s20 = smov %s906_s21 }
 0x59c   : > { %s1212_s21 = smov %s910_s22  ;;  %s1213_s22 = smov %s997_s28 }
 0x59d   : > { %s1214_s23 = smov %s985_s25  ;;  %23 = sbr.rel (!%p21_p2) target bundleno = 11 (0xb), region = 94 }
 0x5a2   :  { %574 = vsyncpa [#allocation4], 1 }
 0x5a3   :  { %576 = vsyncpa [#allocation4 + $0x1], 1 }
 0x5a4   :  { %577 = vsyncpa [#allocation9], 1 }
 0x5a5   :  { %578 = vsyncpa [#allocation5], 1 }
 0x5a6   :  { %580 = vsyncpa [#allocation5 + $0x1], 1 }
 0x5a7   :  { %581 = vsyncpa [#allocation6], 1 }
 0x5a8   :  { %583 = vsyncpa [#allocation6 + $0x1], 1 }

</bundles_post_ra>
